<compile_context>
chip_gen: v7x
topology: tpu7x:2x2x1
jax: 0.10.0
libtpu: 0.0.40
codegen_flags: <defaults>
</compile_context>

<pallas_src>
import functools

import jax
import jax.numpy as jnp
from jax import lax
from jax.experimental import pallas as pl
from jax.experimental.pallas import tpu as pltpu


def _round_up(x, m):
    return (x + m - 1) // m * m


def _embed_kernel(ids_ref, tbd_ref, out_ref, *, vocab, group, chunk_rows):
    """Gather `group` embeddings per output row via a packed one-hot matmul.

    ids_ref: (tile_rows, group) int32       token ids, `group` tokens per row
    tbd_ref: (group*vocab, group*D)         block-diagonal table (VMEM resident)
    out_ref: (tile_rows, group*D)           packed embeddings (lane-dense if D<128)
    """
    tile_rows = ids_ref.shape[0]
    gv = tbd_ref.shape[0]                       # group * vocab
    n_chunks = tile_rows // chunk_rows          # exact by construction

    # Constants hoisted out of the chunk loop (iota / mul / cmp only; no div/mod).
    # rep[a, c] = 1.0  iff  lane c lies in group a's range [a*vocab, (a+1)*vocab).
    lane_c = lax.broadcasted_iota(jnp.int32, (group, gv), 1)
    lane_a = lax.broadcasted_iota(jnp.int32, (group, gv), 0)
    off = lane_c - vocab * lane_a
    rep = ((off >= 0) & (off < vocab)).astype(jnp.float32)            # (G, G*V)
    col = lax.broadcasted_iota(jnp.int32, (chunk_rows, gv), 1).astype(jnp.float32)
    grp_off = vocab * lax.broadcasted_iota(jnp.int32, (chunk_rows, group), 1)
    tbd = tbd_ref[...]                                                # (G*V, G*D)

    def chunk_body(c, carry):
        r0 = pl.multiple_of(c * chunk_rows, chunk_rows)
        ids = ids_ref[pl.ds(r0, chunk_rows), :]                       # (chunk, G) i32
        key = (ids + grp_off).astype(jnp.float32)                     # id + a*vocab
        # Replicate each group's key across its V lanes with a tiny MXU matmul
        # (exact for small integers; avoids cross-lane relayouts).
        key_rep = jnp.dot(key, rep, preferred_element_type=jnp.float32)  # (chunk, G*V)
        one_hot = (key_rep == col).astype(tbd.dtype)
        # Gather = one-hot @ block-diagonal table (exact row selection).
        out_ref[pl.ds(r0, chunk_rows), :] = jnp.dot(
            one_hot, tbd, preferred_element_type=jnp.float32
        ).astype(out_ref.dtype)
        return carry

    lax.fori_loop(0, n_chunks, chunk_body, 0, unroll=n_chunks <= 8)


def protein_embedding_forward(sequence, table, *, out_block_bytes=2 << 20):
    """sequence: (B, S) int ids; table: (V, D) float -> (S, B, D) float."""
    b, s = sequence.shape
    v, d = table.shape
    itemsize = jnp.dtype(table.dtype).itemsize
    n = s * b

    # Pack G = 128 // D tokens per output row so the output block's last dim is
    # exactly 128 lanes (lane-dense stores + contiguous writeback DMA).
    if d < 128 and 128 % d == 0:
        g = 128 // d
    else:
        g = 1  # TODO(synk): D < 128 but not a divisor of 128 -> output stays lane-padded.
    gd = g * d
    gv = g * v

    # Block-diagonal table: kron(I_G, table) places table[ids[r, a]] into output
    # columns [a*D, (a+1)*D) of packed row r.  Tiny (<=64 KiB), VMEM resident.
    table_bd = table if g == 1 else jnp.kron(jnp.eye(g, dtype=table.dtype), table)

    # Cheap int32 transpose to (S, B) flat order, packed G tokens per row, so the
    # kernel's flat (rows, G*D) output is bit-identical to (S*B, D) row-major.
    n_g = _round_up(n, g)
    ids_flat = jnp.transpose(sequence).astype(jnp.int32).reshape(n)
    if n_g != n:
        ids_flat = jnp.pad(ids_flat, (0, n_g - n))   # id 0 is valid; sliced off below
    rows = n_g // g
    ids2d = ids_flat.reshape(rows, g)

    # Row-tile sizing: ~out_block_bytes of *padded* VMEM per output buffer
    # (sweet spot 2-4 MiB; 2 MiB keeps v5e's scoped VMEM comfortable).  Prefer a
    # divisor of `rows` so the padded-output slice/copy is never needed.
    row_bytes = _round_up(gd, 128) * itemsize
    max_rows = max(8, (out_block_bytes // row_bytes) // 8 * 8)
    if rows <= max_rows:
        tile_rows = rows
    else:
        tile_rows = 0
        t = max_rows
        while t >= 8:
            if rows % t == 0:
                tile_rows = t
                break
            t -= 8
        if tile_rows == 0:
            tile_rows = max_rows       # fallback: pad rows (adds one slice below)
    rows_pad = _round_up(rows, tile_rows)
    if rows_pad != rows:
        ids2d = jnp.pad(ids2d, ((0, rows_pad - rows), (0, 0)))

    # In-kernel chunk size: bounds the one-hot temporaries at large tile_rows.
    if tile_rows <= 1024:
        chunk_rows = tile_rows
    else:
        chunk_rows = 8
        c = 1024
        while c >= 8:
            if tile_rows % c == 0:
                chunk_rows = c
                break
            c -= 8

    grid = rows_pad // tile_rows

    # Explicit scoped-VMEM budget from the *padded* block footprints:
    # 2x out + 2x ids + 2x table (double-buffered) + in-kernel temporaries.
    out_block_b = _round_up(tile_rows, 8) * _round_up(gd, 128) * itemsize
    id_block_b = _round_up(tile_rows, 8) * _round_up(g, 128) * 4
    tbd_block_b = _round_up(gv, 8) * _round_up(gd, 128) * itemsize
    scratch_b = 4 * _round_up(chunk_rows, 8) * _round_up(gv, 128) * 4
    vmem_need = 2 * (out_block_b + id_block_b + tbd_block_b) + scratch_b
    vmem_limit = int(min(max(vmem_need + (6 << 20), 16 << 20), 32 << 20))

    kernel = functools.partial(_embed_kernel, vocab=v, group=g, chunk_rows=chunk_rows)
    out = pl.pallas_call(
        kernel,
        out_shape=jax.ShapeDtypeStruct((rows_pad, gd), table.dtype),
        grid_spec=pltpu.PrefetchScalarGridSpec(
            num_scalar_prefetch=0,
            grid=(grid,),
            in_specs=[
                pl.BlockSpec((tile_rows, g), lambda i: (i, 0)),   # packed ids
                pl.BlockSpec((gv, gd), lambda i: (0, 0)),         # table resident
            ],
            out_specs=pl.BlockSpec((tile_rows, gd), lambda i: (i, 0)),
        ),
        compiler_params=pltpu.CompilerParams(
            # Row tiles are independent -> shard across v7x's 2 TensorCores.
            # TODO(synk): if plain "parallel" does not split across v7x cores,
            #             switch to a core-parallel leading grid axis.
            dimension_semantics=("parallel",),
            vmem_limit_bytes=vmem_limit,
        ),
    )(ids2d, table_bd)

    # Free reshape: (rows_pad, G*D) row-major == (rows_pad*G, D) row-major.
    flat = out.reshape(rows_pad * g, d)
    if rows_pad * g != n:
        flat = flat[:n]   # only taken when token/row padding was required (rare)
    return flat.reshape(s, b, d)


if __name__ == "__main__":
    vocab_size = 32
    embedding_dim = 32
    batch = 2
    seq_len = 8

    key = jax.random.PRNGKey(0)
    k_tab, k_seq = jax.random.split(key)

    # Deterministic parameter init (nn.Embedding default is N(0, 1)).
    table = jax.random.normal(k_tab, (vocab_size, embedding_dim), dtype=jnp.float32)
    sequence = jax.random.randint(
        k_seq, (batch, seq_len), 0, vocab_size, dtype=jnp.int32
    )

    out = protein_embedding_forward(sequence, table)
    out = jax.block_until_ready(out)

    # Sanity check against a plain-JAX reference: embed then transpose(0,1).
    ref = jnp.take(table, sequence, axis=0).transpose(1, 0, 2)
    assert out.shape == (seq_len, batch, embedding_dim), out.shape
    assert jnp.allclose(out, ref, atol=1e-6), "mismatch vs reference gather"

    print("KERNEL_OK")
</pallas_src>

<mosaic_0001>
module attributes {stable_mosaic.version = 11 : i64} {
  func.func @_embed_kernel(%arg0: i32, %arg1: memref<4x4xi32, #tpu.memory_space<vmem>>, %arg2: memref<128x128xf32, #tpu.memory_space<vmem>>, %arg3: memref<4x128xf32, #tpu.memory_space<vmem>>) attributes {dimension_semantics = [#tpu.dimension_semantics<parallel>], iteration_bounds = array<i64: 1>, scalar_prefetch = 0 : i64, scratch_operands = 0 : i64, tpu.core_type = #tpu.core_type<tc>, window_params = [{transform_indices = @transform_0, window_bounds = array<i64: 4, 4>}, {pipeline_mode = #tpu.pipeline_mode<synchronous>, transform_indices = @transform_1, window_bounds = array<i64: 128, 128>}, {transform_indices = @transform_2, window_bounds = array<i64: 4, 128>}]} {
    %0 = tpu.iota {dimensions = array<i32: 1>} : vector<4x128xi32>
    %1 = tpu.iota {dimensions = array<i32: 0>} : vector<4x128xi32>
    %c32_i32 = arith.constant 32 : i32
    %2 = vector.broadcast %c32_i32 : i32 to vector<4x128xi32>
    %3 = arith.muli %2, %1 : vector<4x128xi32>
    %4 = arith.subi %0, %3 : vector<4x128xi32>
    %c0_i32 = arith.constant 0 : i32
    %5 = vector.broadcast %c0_i32 : i32 to vector<4x128xi32>
    %6 = arith.cmpi sge, %4, %5 : vector<4x128xi32>
    %c32_i32_0 = arith.constant 32 : i32
    %7 = vector.broadcast %c32_i32_0 : i32 to vector<4x128xi32>
    %8 = arith.cmpi slt, %4, %7 : vector<4x128xi32>
    %9 = arith.andi %6, %8 : vector<4x128xi1>
    %10 = arith.extui %9 : vector<4x128xi1> to vector<4x128xi32>
    %11 = arith.sitofp %10 : vector<4x128xi32> to vector<4x128xf32>
    %12 = tpu.iota {dimensions = array<i32: 1>} : vector<4x128xi32>
    %13 = arith.sitofp %12 : vector<4x128xi32> to vector<4x128xf32>
    %14 = tpu.iota {dimensions = array<i32: 1>} : vector<4x4xi32>
    %c32_i32_1 = arith.constant 32 : i32
    %15 = vector.broadcast %c32_i32_1 : i32 to vector<4x4xi32>
    %16 = arith.muli %15, %14 : vector<4x4xi32>
    %c0 = arith.constant 0 : index
    %c0_2 = arith.constant 0 : index
    %17 = vector.load %arg2[%c0, %c0_2] : memref<128x128xf32, #tpu.memory_space<vmem>>, vector<128x128xf32>
    %c0_i32_3 = arith.constant 0 : i32
    %c4_i32 = arith.constant 4 : i32
    %18 = arith.muli %c0_i32_3, %c4_i32 : i32
    %19 = tpu.assume_multiple %18, 4 : i32
    %20 = arith.index_cast %19 : i32 to index
    %c0_4 = arith.constant 0 : index
    %21 = vector.load %arg1[%20, %c0_4] : memref<4x4xi32, #tpu.memory_space<vmem>>, vector<4x4xi32>
    %22 = arith.addi %21, %16 : vector<4x4xi32>
    %23 = arith.sitofp %22 : vector<4x4xi32> to vector<4x4xf32>
    %cst = arith.constant dense<0.000000e+00> : vector<4x128xf32>
    %24 = tpu.matmul %23, %11, %cst {dimension_numbers = #tpu.dot_dimension_numbers<[1], [0], [0], [1], [0, 0, 1, 1], [], []>} : vector<4x4xf32>, vector<4x128xf32>, vector<4x128xf32> -> vector<4x128xf32>
    %25 = arith.cmpf oeq, %24, %13 : vector<4x128xf32>
    %26 = arith.extui %25 : vector<4x128xi1> to vector<4x128xi32>
    %27 = arith.sitofp %26 : vector<4x128xi32> to vector<4x128xf32>
    %cst_5 = arith.constant dense<0.000000e+00> : vector<4x128xf32>
    %28 = tpu.matmul %27, %17, %cst_5 {dimension_numbers = #tpu.dot_dimension_numbers<[1], [0], [0], [1], [0, 0, 1, 1], [], []>} : vector<4x128xf32>, vector<128x128xf32>, vector<4x128xf32> -> vector<4x128xf32>
    %29 = arith.index_cast %19 : i32 to index
    %c0_6 = arith.constant 0 : index
    %30 = vector.load %arg3[%29, %c0_6] : memref<4x128xf32, #tpu.memory_space<vmem>>, vector<4x128xf32>
    tpu.vector_store %arg3[%29, %c0_6], %28 {strides = array<i32>} : memref<4x128xf32, #tpu.memory_space<vmem>>, vector<4x128xf32>,
    %c1_i32 = arith.constant 1 : i32
    return
  }
  func.func @transform_0(%arg0: i32) -> (i32, i32) {
    %c0_i32 = arith.constant 0 : i32
    %c0_i32_0 = arith.constant 0 : i32
    return %arg0, %c0_i32 : i32, i32
  }
  func.func @transform_1(%arg0: i32) -> (i32, i32) {
    %c0_i32 = arith.constant 0 : i32
    %c0_i32_0 = arith.constant 0 : i32
    %c0_i32_1 = arith.constant 0 : i32
    return %c0_i32, %c0_i32_0 : i32, i32
  }
  func.func @transform_2(%arg0: i32) -> (i32, i32) {
    %c0_i32 = arith.constant 0 : i32
    %c0_i32_0 = arith.constant 0 : i32
    return %arg0, %c0_i32 : i32, i32
  }
}

</mosaic_0001>

<bundles_post_ra>
// kernel: tpu_custom_call.1
= control target key start
LH: loop header
LB: loop body
LE: loop exit
PB: predicated region body
PF: predicated region fallthrough
CT: control target
= control target key end

     0   :  { %7 = vsyncpa [#allocation3], 0  ;;  %s475_s0 = inlined_call_operand.hbm [shape: s32[4,4], index: 0, kind: input, shape index: {}]   ;;  %s476_s1 = inlined_call_operand.hbm [shape: f32[128,128], index: 1, kind: input, shape index: {}]   ;;  %s477_s2 = inlined_call_operand.hbm [shape: f32[4,128], index: 2, kind: output, shape index: {}]  }
   0x1   :  { %8 = vsyncpa [#allocation6], 0 }
   0x2   :  { %9 = vsyncpa [#allocation4], 0  ;;  %s407_s9 = smov [#allocation2]   ;;  %s408_s11 = smov [#allocation5]  }
   0x3   :  { %s16_s10 = sshll.u32 %s407_s9, 4  ;;  %s25_s12 = sshll.u32 %s408_s11, 4  ;;  %s17_s10 = int_to_ptr.vmem [resolvable:$true] %s16_s10  ;;  %s431_s12 = int_to_ptr.vmem [resolvable:$true] %s25_s12 }
   0x4   :  { %s335_s15 = scalar_lea.hbm %s475_s0, 64 }
   0x5   :  { %p336_p0 = scmp.ne.s32.totalorder %s475_s0, %s335_s15  ;;  %p339_p1 = scmp.lt.u32.totalorder %s335_s15, %s475_s0 }
   0x7   :  { %p341_p2 = pnand %p339_p1, %p336_p0 }
   0x9   :  { %344 = shalt.err (!%p341_p2)
}
   0xa   :  { %s345_s20 = scalar_lea.vmem %s17_s10, 64  ;;  %p350_p4 = scmp.lt.s32.totalorder %s17_s10, %s17_s10 }
   0xb   :  { %p346_p3 = scmp.ne.s32.totalorder %s17_s10, %s345_s20  ;;  %p351_p5 = scmp.lt.s32.totalorder %s345_s20, %s345_s20 }
   0xd   :  { %p352_p6 = por %p351_p5, %p350_p4 }
   0xf   :  { %p353_p7 = pnand %p352_p6, %p346_p3 }
  0x11   :  { %356 = shalt.err (!%p353_p7)
}
  0x12   :  { %19 = dma.hbm_to_vmem [thread:$0]  %s475_s0, 64, %s17_s10, [#allocation3]  }
  0x13   :  { %s357_s25 = scalar_lea.hbm %s476_s1, 2048 }
  0x14   :  { %p358_p8 = scmp.ne.s32.totalorder %s476_s1, %s357_s25  ;;  %p361_p9 = scmp.lt.u32.totalorder %s357_s25, %s476_s1 }
  0x16   :  { %p363_p10 = pnand %p361_p9, %p358_p8 }
  0x18   :  { %366 = shalt.err (!%p363_p10)
}
  0x19   :  { %s367_s30 = scalar_lea.vmem %s431_s12, 2048  ;;  %p372_p12 = scmp.lt.s32.totalorder %s431_s12, %s431_s12 }
  0x1a   :  { %p368_p11 = scmp.ne.s32.totalorder %s431_s12, %s367_s30  ;;  %p373_p13 = scmp.lt.s32.totalorder %s367_s30, %s367_s30 }
  0x1c   :  { %p374_p0 = por %p373_p13, %p372_p12 }
  0x1e   :  { %p375_p1 = pnand %p374_p0, %p368_p11 }
  0x20   :  { %378 = shalt.err (!%p375_p1)
}
  0x21   :  { %s409_s0 = smov 128   ;;  %s410_s3 = smov 8  }
  0x22   :  { %31 = dma.hbm_to_vmem [thread:$0]  %s476_s1, 2048, %s431_s12, [#allocation6], %s409_s0, %s409_s0, %s410_s3  }
  0x23   :  { %401 = dma.done.wait [#allocation3], 64  }
  0x24   :  { %402 = vsyncadd [#allocation3], 4294967232 }
  0x25   :  { %403 = dma.done.wait [#allocation6], 2048  }
  0x26   :  { %404 = vsyncadd [#allocation6], 4294965248  ;;  %v38_v0 = vlaneseq  ;;  %v411_v1 = vmov 0.0   ;;  %vm412_vm0 = vmmov 0   ;;  %v413_v4 = vmov 0.0|0.0   ;;  %v51_v9 = vld [vmem:[#allocation5] sm:$0xff] }
  0x27   :  { %262 = vmatprep.subr.mxu0 %v411_v1  ;;  %264 = vmatprep.mubr.msk.f32.mxu0 %vm412_vm0, %v411_v1  ;;  %vm74_vm1 = vcmask 1043456   ;;  %v67_v8 = vld [vmem:[#allocation2] sm:$0xf]  ;;  %v52_v10 = vld [vmem:[#allocation5 + $0x8] sm:$0xff]  ;;  %v53_v13 = vld [vmem:[#allocation5 + $0x10] sm:$0xff]  ;;  %vm70_vm5 = vcmask 31744  }
  0x28   :  { %v39_v2 = vand.u32 127, %v38_v0  ;;  %v41_v3 = vshrl.u32 %v38_v0, 7  ;;  %302 = vmatprep.subr.bf16.mxu1 %v413_v4  ;;  %299 = vmatprep.mubr.msk.f32.mxu1 %vm412_vm0, %v411_v1  ;;  %v303_v12 = vpack.c.bf16 %v52_v10, %v51_v9  ;;  %v54_v14 = vld [vmem:[#allocation5 + $0x18] sm:$0xff]  ;;  %v55_v18 = vld [vmem:[#allocation5 + $0x20] sm:$0xff]  ;;  %v56_v19 = vld [vmem:[#allocation5 + $0x28] sm:$0xff]  ;;  %v414_v39 = vmov 1.0  }
  0x29   :  { %v306_v17 = vpack.c.bf16 %v54_v14, %v53_v13  ;;  %v309_v20 = vpack.c.bf16 %v56_v19, %v55_v18  ;;  %v57_v21 = vld [vmem:[#allocation5 + $0x30] sm:$0xff]  ;;  %v58_v22 = vld [vmem:[#allocation5 + $0x38] sm:$0xff]  ;;  %v59_v24 = vld [vmem:[#allocation5 + $0x40] sm:$0xff]  ;;  %s415_s1 = smov [#allocation7]  }
  0x2a   :  { %v42_v5 = vmul.u32 32, %v41_v3  ;;  %v50_v6 = vmul.u32 32, %v39_v2  ;;  %304 = vmatpush3.bf16.msra.mxu1 %v303_v12  ;;  %v312_v23 = vpack.c.bf16 %v58_v22, %v57_v21  ;;  %v60_v25 = vld [vmem:[#allocation5 + $0x48] sm:$0xff]  ;;  %v61_v27 = vld [vmem:[#allocation5 + $0x50] sm:$0xff]  ;;  %v62_v28 = vld [vmem:[#allocation5 + $0x58] sm:$0xff]  ;;  %v49_v36 = vcvt.s32.f32 %v39_v2  ;;  %s228_s6 = sshll.u32 %s415_s1, 4  ;;  %s229_s6 = int_to_ptr.vmem [resolvable:$true] %s228_s6 }
  0x2b   :  { %305 = vmatprep.subr.bf16.mxu1 %v413_v4  ;;  %v315_v26 = vpack.c.bf16 %v60_v25, %v59_v24  ;;  %v318_v29 = vpack.c.bf16 %v62_v28, %v61_v27  ;;  %v63_v30 = vld [vmem:[#allocation5 + $0x60] sm:$0xff]  ;;  %v64_v31 = vld [vmem:[#allocation5 + $0x68] sm:$0xff]  ;;  %v65_v33 = vld [vmem:[#allocation5 + $0x70] sm:$0xff]  ;;  %s379_s7 = scalar_lea.vmem %s229_s6, 64  ;;  %p384_p3 = scmp.lt.s32.totalorder %s229_s6, %s229_s6 }
  0x2c   :  { %v43_v7 = vsub.s32 %v39_v2, %v42_v5  ;;  %v68_v11 = vadd.s32 %v67_v8, %v50_v6  ;;  %v321_v32 = vpack.c.bf16 %v64_v31, %v63_v30  ;;  %v66_v34 = vld [vmem:[#allocation5 + $0x78] sm:$0xff]  ;;  %p380_p2 = scmp.ne.s32.totalorder %s229_s6, %s379_s7  ;;  %p385_p4 = scmp.lt.s32.totalorder %s379_s7, %s379_s7 }
  0x2d   :  { %v324_v35 = vpack.c.bf16 %v66_v34, %v65_v33 }
  0x2e   :  { %vm44_vm2 = vcmp.ge.s32.totalorder %v43_v7, 0  ;;  %vm45_vm3 = vcmp.lt.s32.totalorder %v43_v7, 32  ;;  %v69_v16 = vcvt.s32.f32 %v68_v11  ;;  %307 = vmatpush3.bf16.msra.mxu1 %v306_v17  ;;  %p386_p5 = por %p385_p4, %p384_p3 }
  0x2f   :  { %vm46_vm4 = vmand %vm44_vm2, %vm45_vm3  ;;  %308 = vmatprep.subr.bf16.mxu1 %v413_v4 }
  0x30   :  { %v238_v15 = vsel %vm46_vm4, 1.0, %v411_v1  ;;  %p387_p6 = pnand %p386_p5, %p380_p2 }
  0x31   :  { %263 = vmatpush3.msk.msra.mxu0 %vm74_vm1, %v238_v15 }
  0x32   :  { %265 = vmatmul.mubr.msk.f32.vlgmr.msra.gmra.mrb[0].mxu0 %vm70_vm5, %v69_v16  ;;  %310 = vmatpush3.bf16.msra.mxu1 %v309_v20 }
  0x33   :  { %311 = vmatprep.subr.bf16.mxu1 %v413_v4 }
  0x36   :  { %313 = vmatpush3.bf16.msra.mxu1 %v312_v23 }
  0x37   :  { %314 = vmatprep.subr.bf16.mxu1 %v413_v4 }
  0x3a   :  { %316 = vmatpush3.bf16.msra.mxu1 %v315_v26 }
  0x3b   :  { %317 = vmatprep.subr.bf16.mxu1 %v413_v4 }
  0x3e   :  { %319 = vmatpush3.bf16.msra.mxu1 %v318_v29 }
  0x3f   :  { %320 = vmatprep.subr.bf16.mxu1 %v413_v4 }
  0x42   :  { %322 = vmatpush3.bf16.msra.mxu1 %v321_v32 }
  0x43   :  { %323 = vmatprep.subr.bf16.mxu1 %v413_v4 }
  0x46   :  { %325 = vmatpush3.bf16.msra.mxu1 %v324_v35 }
 0x105   :  { %v144_v37 = vpop.f32.mrb[0].mxu0 }
 0x106   :  { %vm148_vm6 = vcmp.eq.f32.partialorder %v144_v37, %v49_v36  ;;  %v266_v38 = vpop.f32.mrb[1].mxu0 }
 0x107   :  { %300 = vmatmul.mubr.msk.f32.vlgmr.msra.gmra.mrb[0].mxu1 %vm148_vm6, %v414_v39 }
 0x1da   :  { %v217_v40 = vpop.f32.mrb[0].mxu1 }
 0x1db   :  { %221 = vst [vmem:[#allocation7] sm:$0xf] %v217_v40  ;;  %v301_v41 = vpop.f32.mrb[1].mxu1 }
 0x1dc   :  { %390 = shalt.err (!%p387_p6)
}
 0x1dd   :  { %s391_s10 = scalar_lea.hbm %s477_s2, 64 }
 0x1de   :  { %p392_p7 = scmp.ne.s32.totalorder %s477_s2, %s391_s10  ;;  %p395_p8 = scmp.lt.u32.totalorder %s391_s10, %s477_s2 }
 0x1e0   :  { %p397_p9 = pnand %p395_p8, %p392_p7 }
 0x1e2   :  { %400 = shalt.err (!%p397_p9)
}
 0x1e3   :  { %231 = dma.vmem_to_hbm [thread:$0]  %s229_s6, 64, %s477_s2, [#allocation4]  }
 0x1e4   :  { %405 = dma.done.wait [#allocation4], 64  }
 0x1e5   :  { %406 = vsyncadd [#allocation4], 4294967232 }
 0x1e6   :  { %235 = vsyncpa [#allocation3], 1 }
 0x1e7   :  { %236 = vsyncpa [#allocation6], 1 }
 0x1e8   :  { %237 = vsyncpa [#allocation4], 1 }

</bundles_post_ra>
